<compile_context>
chip_gen: v7x
topology: tpu7x:2x2x1
jax: 0.10.0
libtpu: 0.0.40
codegen_flags: <defaults>
</compile_context>

<pallas_src>
import math

import jax
import jax.numpy as jnp
from jax.experimental import pallas as pl
from jax.experimental.pallas import tpu as pltpu


def _pgc_kernel(adj_ref, xk_ref, xij_ref, mask_ref, o_ref):
    """One (i, j) output tile; grid axis 2 reduces over K (source nodes).

    adj_ref : (tm, tk) bf16   adjacency tile
    xk_ref  : (tk, tn) bf16   feature tile used by the matmul
    xij_ref : (tm, tn) f32    exact feature tile for the pass-through columns
    mask_ref: (1,  tn) f32    1.0 where the column is "dropped" (keep input)
    o_ref   : (tm, tn) f32    output tile; VMEM-resident across k -> accumulator
    """
    k = pl.program_id(2)

    @pl.when(k == 0)
    def _():
        o_ref[...] = jnp.zeros_like(o_ref)

    # hi tile accumulation on the MXU: bf16 operands, f32 accumulation.
    o_ref[...] += jnp.dot(
        adj_ref[...], xk_ref[...], preferred_element_type=jnp.float32
    )

    @pl.when(k == pl.num_programs(2) - 1)
    def _():
        keep_input = mask_ref[...] > 0.5  # (1, tn) bool, broadcasts over rows
        o_ref[...] = jnp.where(keep_input, xij_ref[...], o_ref[...])


def _round_up(a, m):
    return ((a + m - 1) // m) * m


def part_graph_convolution(x, adj, rate, l, key, *,
                           tm_max=256, tn_max=512, tk_max=512):
    """JAX/Pallas equivalent of Part_GraphConvolution.forward.

    x   : [N, F] float32 node features
    adj : [N, N] float32 adjacency (dense stand-in for torch.sparse.mm)
    rate, l : python scalars
    key : jax PRNG key driving the column-drop randomness
    """
    N, F = x.shape
    assert adj.shape == (N, N)

    # ----- rate schedule (python scalars, matches the torch code) -----
    if l <= 2:
        eff_rate = 0.0
    else:
        eff_rate = 1.0 - math.log(rate / (l + 1) + 1.0)

    # ----- drop mask: uniform-per-column OR one randomly forced column -----
    k_unif, k_idx = jax.random.split(key)
    unif = jax.random.uniform(k_unif, (F,), dtype=jnp.float32)
    base_mask = unif < jnp.float32(eff_rate)
    forced_idx = jax.random.randint(k_idx, (), 0, F)  # random.shuffle of one-hot
    drop_mask = jnp.logical_or(base_mask, jnp.arange(F) == forced_idx)

    # ----- tiling: (8,128)-aligned tiles, clamped to the (padded) problem ----
    tm = min(tm_max, _round_up(N, 8))     # output rows      (sublane-aligned)
    tn = min(tn_max, _round_up(F, 128))   # output cols      (lane-dense)
    tk = min(tk_max, _round_up(N, 128))   # reduction chunk  (lane-aligned)

    Nm = _round_up(N, tm)   # padded row count for adj rows / output rows
    Nk = _round_up(N, tk)   # padded reduction extent (adj cols / x rows)
    Fp = _round_up(F, tn)   # padded feature dim

    # Padded operands. bf16 for the MXU operands; exact f32 pass-through copy
    # of x for the "dropped" columns; f32 output/accumulation.
    adj_bf = jnp.zeros((Nm, Nk), jnp.bfloat16).at[:N, :N].set(
        adj.astype(jnp.bfloat16))
    xk_bf = jnp.zeros((Nk, Fp), jnp.bfloat16).at[:N, :F].set(
        x.astype(jnp.bfloat16))
    xij_f32 = jnp.zeros((Nm, Fp), jnp.float32).at[:N, :F].set(
        x.astype(jnp.float32))
    mask_f = jnp.zeros((1, Fp), jnp.float32).at[0, :F].set(
        drop_mask.astype(jnp.float32))

    grid = (Nm // tm, Fp // tn, Nk // tk)

    out = pl.pallas_call(
        _pgc_kernel,
        out_shape=jax.ShapeDtypeStruct((Nm, Fp), jnp.float32),
        grid_spec=pltpu.PrefetchScalarGridSpec(
            num_scalar_prefetch=0,
            grid=grid,
            in_specs=[
                pl.BlockSpec((tm, tk), lambda i, j, k: (i, k)),   # adj tile
                pl.BlockSpec((tk, tn), lambda i, j, k: (k, j)),   # x for matmul
                pl.BlockSpec((tm, tn), lambda i, j, k: (i, j)),   # x passthrough
                pl.BlockSpec((1, tn), lambda i, j, k: (0, j)),    # column mask
            ],
            out_specs=pl.BlockSpec((tm, tn), lambda i, j, k: (i, j)),
        ),
        compiler_params=pltpu.CompilerParams(
            dimension_semantics=("parallel", "parallel", "arbitrary"),
            vmem_limit_bytes=64 * 1024 * 1024,
        ),
    )(adj_bf, xk_bf, xij_f32, mask_f)

    return out[:N, :F].astype(x.dtype)


def _reference(x, adj, rate, l, key):
    """Plain-JAX reference with the same mask construction and bf16 matmul."""
    N, F = x.shape
    if l <= 2:
        eff_rate = 0.0
    else:
        eff_rate = 1.0 - math.log(rate / (l + 1) + 1.0)
    k_unif, k_idx = jax.random.split(key)
    unif = jax.random.uniform(k_unif, (F,), dtype=jnp.float32)
    forced_idx = jax.random.randint(k_idx, (), 0, F)
    drop_mask = jnp.logical_or(unif < jnp.float32(eff_rate),
                               jnp.arange(F) == forced_idx)
    hi = jnp.dot(adj.astype(jnp.bfloat16), x.astype(jnp.bfloat16),
                 preferred_element_type=jnp.float32)
    return jnp.where(drop_mask[None, :], x, hi)


if __name__ == "__main__":
    root = jax.random.PRNGKey(0)

    # Case A: tiny shape matching the module's scale (N nodes, F features).
    # Case B: larger shape exercising real tiling, padding and the k-reduction.
    cases = [
        dict(N=16, F=32, rate=0.5, l=4),
        dict(N=600, F=200, rate=0.5, l=5),
    ]

    for c_idx, c in enumerate(cases):
        k_case = jax.random.fold_in(root, c_idx)
        k_x, k_adj, k_mask = jax.random.split(k_case, 3)
        N, F = c["N"], c["F"]
        x = jax.random.normal(k_x, (N, F), dtype=jnp.float32)
        adj = jax.random.uniform(k_adj, (N, N), dtype=jnp.float32)

        out = part_graph_convolution(x, adj, c["rate"], c["l"], k_mask)
        jax.block_until_ready(out)

        ref = _reference(x, adj, c["rate"], c["l"], k_mask)
        assert out.shape == (N, F)
        assert jnp.allclose(out, ref, atol=1e-2, rtol=1e-2), (
            f"mismatch in case {c_idx}: max err "
            f"{jnp.max(jnp.abs(out - ref))}")

    print("KERNEL_OK")
</pallas_src>

<mosaic_0001>
module attributes {stable_mosaic.version = 11 : i64} {
  func.func @_pgc_kernel(%arg0: i32, %arg1: i32, %arg2: i32, %arg3: memref<16x128xbf16, #tpu.memory_space<vmem>>, %arg4: memref<128x128xbf16, #tpu.memory_space<vmem>>, %arg5: memref<16x128xf32, #tpu.memory_space<vmem>>, %arg6: memref<1x128xf32, #tpu.memory_space<vmem>>, %arg7: memref<16x128xf32, #tpu.memory_space<vmem>>) attributes {dimension_semantics = [#tpu.dimension_semantics<parallel>, #tpu.dimension_semantics<parallel>, #tpu.dimension_semantics<arbitrary>], iteration_bounds = array<i64: 1, 1, 1>, scalar_prefetch = 0 : i64, scratch_operands = 0 : i64, tpu.core_type = #tpu.core_type<tc>, window_params = [{transform_indices = @transform_0, window_bounds = array<i64: 16, 128>}, {transform_indices = @transform_1, window_bounds = array<i64: 128, 128>}, {transform_indices = @transform_2, window_bounds = array<i64: 16, 128>}, {transform_indices = @transform_3, window_bounds = array<i64: 1, 128>}, {transform_indices = @transform_4, window_bounds = array<i64: 16, 128>}]} {
    %c0_i32 = arith.constant 0 : i32
    %0 = arith.cmpi eq, %arg2, %c0_i32 : i32
    %1 = arith.extui %0 : i1 to i32
    %c0_i32_0 = arith.constant 0 : i32
    %2 = arith.cmpi ne, %1, %c0_i32_0 : i32
    scf.if %2 {
      %cst_10 = arith.constant 0.000000e+00 : f32
      %12 = vector.broadcast %cst_10 : f32 to vector<16x128xf32>
      %c0_11 = arith.constant 0 : index
      %c0_12 = arith.constant 0 : index
      %13 = vector.load %arg7[%c0_11, %c0_12] : memref<16x128xf32, #tpu.memory_space<vmem>>, vector<16x128xf32>
      tpu.vector_store %arg7[%c0_11, %c0_12], %12 {strides = array<i32>} : memref<16x128xf32, #tpu.memory_space<vmem>>, vector<16x128xf32>,
    } else {
    }
    %c0 = arith.constant 0 : index
    %c0_1 = arith.constant 0 : index
    %3 = vector.load %arg7[%c0, %c0_1] : memref<16x128xf32, #tpu.memory_space<vmem>>, vector<16x128xf32>
    %c0_2 = arith.constant 0 : index
    %c0_3 = arith.constant 0 : index
    %4 = vector.load %arg3[%c0_2, %c0_3] : memref<16x128xbf16, #tpu.memory_space<vmem>>, vector<16x128xbf16>
    %c0_4 = arith.constant 0 : index
    %c0_5 = arith.constant 0 : index
    %5 = vector.load %arg4[%c0_4, %c0_5] : memref<128x128xbf16, #tpu.memory_space<vmem>>, vector<128x128xbf16>
    %cst = arith.constant dense<0.000000e+00> : vector<16x128xf32>
    %6 = tpu.matmul %4, %5, %cst {dimension_numbers = #tpu.dot_dimension_numbers<[1], [0], [0], [1], [0, 0, 1, 1], [], []>} : vector<16x128xbf16>, vector<128x128xbf16>, vector<16x128xf32> -> vector<16x128xf32>
    %7 = arith.addf %3, %6 : vector<16x128xf32>
    %c0_6 = arith.constant 0 : index
    %c0_7 = arith.constant 0 : index
    %8 = vector.load %arg7[%c0_6, %c0_7] : memref<16x128xf32, #tpu.memory_space<vmem>>, vector<16x128xf32>
    tpu.vector_store %arg7[%c0_6, %c0_7], %7 {strides = array<i32>} : memref<16x128xf32, #tpu.memory_space<vmem>>, vector<16x128xf32>,
    %c0_i32_8 = arith.constant 0 : i32
    %9 = arith.cmpi eq, %arg2, %c0_i32_8 : i32
    %10 = arith.extui %9 : i1 to i32
    %c0_i32_9 = arith.constant 0 : i32
    %11 = arith.cmpi ne, %10, %c0_i32_9 : i32
    scf.if %11 {
      %c0_10 = arith.constant 0 : index
      %c0_11 = arith.constant 0 : index
      %12 = vector.load %arg6[%c0_10, %c0_11] : memref<1x128xf32, #tpu.memory_space<vmem>>, vector<1x128xf32>
      %cst_12 = arith.constant 5.000000e-01 : f32
      %13 = vector.broadcast %cst_12 : f32 to vector<1x128xf32>
      %14 = arith.cmpf ogt, %12, %13 : vector<1x128xf32>
      %c0_13 = arith.constant 0 : index
      %c0_14 = arith.constant 0 : index
      %15 = vector.load %arg5[%c0_13, %c0_14] : memref<16x128xf32, #tpu.memory_space<vmem>>, vector<16x128xf32>
      %c0_15 = arith.constant 0 : index
      %c0_16 = arith.constant 0 : index
      %16 = vector.load %arg7[%c0_15, %c0_16] : memref<16x128xf32, #tpu.memory_space<vmem>>, vector<16x128xf32>
      %17 = vector.shape_cast %14 : vector<1x128xi1> to vector<1x128xi1>
      %18 = vector.broadcast %17 : vector<1x128xi1> to vector<16x128xi1>
      %19 = arith.select %18, %15, %16 : vector<16x128xi1>, vector<16x128xf32>
      %c0_17 = arith.constant 0 : index
      %c0_18 = arith.constant 0 : index
      %20 = vector.load %arg7[%c0_17, %c0_18] : memref<16x128xf32, #tpu.memory_space<vmem>>, vector<16x128xf32>
      tpu.vector_store %arg7[%c0_17, %c0_18], %19 {strides = array<i32>} : memref<16x128xf32, #tpu.memory_space<vmem>>, vector<16x128xf32>,
    } else {
    }
    return
  }
  func.func @transform_0(%arg0: i32, %arg1: i32, %arg2: i32) -> (i32, i32) {
    %c0_i32 = arith.constant 0 : i32
    return %arg0, %arg2 : i32, i32
  }
  func.func @transform_1(%arg0: i32, %arg1: i32, %arg2: i32) -> (i32, i32) {
    %c0_i32 = arith.constant 0 : i32
    return %arg2, %arg1 : i32, i32
  }
  func.func @transform_2(%arg0: i32, %arg1: i32, %arg2: i32) -> (i32, i32) {
    %c0_i32 = arith.constant 0 : i32
    return %arg0, %arg1 : i32, i32
  }
  func.func @transform_3(%arg0: i32, %arg1: i32, %arg2: i32) -> (i32, i32) {
    %c0_i32 = arith.constant 0 : i32
    %c0_i32_0 = arith.constant 0 : i32
    return %c0_i32, %arg1 : i32, i32
  }
  func.func @transform_4(%arg0: i32, %arg1: i32, %arg2: i32) -> (i32, i32) {
    %c0_i32 = arith.constant 0 : i32
    return %arg0, %arg1 : i32, i32
  }
}

</mosaic_0001>

<bundles_post_ra>
// kernel: tpu_custom_call.1
= control target key start
LH: loop header
LB: loop body
LE: loop exit
PB: predicated region body
PF: predicated region fallthrough
CT: control target
= control target key end

     0   :  { %9 = vsyncpa [#allocation3], 0  ;;  %s522_s0 = inlined_call_operand.hbm [shape: bf16[16,128], index: 0, kind: input, shape index: {}]   ;;  %s523_s1 = inlined_call_operand.hbm [shape: bf16[128,128], index: 1, kind: input, shape index: {}]   ;;  %s524_s2 = inlined_call_operand.hbm [shape: f32[16,128], index: 2, kind: input, shape index: {}]   ;;  %s525_s3 = inlined_call_operand.hbm [shape: f32[1,128], index: 3, kind: input, shape index: {}]   ;;  %s526_s4 = inlined_call_operand.hbm [shape: f32[16,128], index: 4, kind: output, shape index: {}]  }
   0x1   :  { %10 = vsyncpa [#allocation6], 0 }
   0x2   :  { %11 = vsyncpa [#allocation9], 0 }
   0x3   :  { %12 = vsyncpa [#allocation4], 0  ;;  %s412_s15 = smov [#allocation5]   ;;  %s413_s17 = smov [#allocation2]  }
   0x4   :  { %s30_s16 = sshll.u32 %s412_s15, 4  ;;  %s18_s18 = sshll.u32 %s413_s17, 4  ;;  %s31_s16 = int_to_ptr.vmem [resolvable:$true] %s30_s16  ;;  %s449_s18 = int_to_ptr.vmem [resolvable:$true] %s18_s18 }
   0x5   :  { %s294_s21 = scalar_lea.hbm %s523_s1, 1024 }
   0x6   :  { %p295_p0 = scmp.ne.s32.totalorder %s523_s1, %s294_s21  ;;  %p298_p1 = scmp.lt.u32.totalorder %s294_s21, %s523_s1 }
   0x8   :  { %p300_p2 = pnand %p298_p1, %p295_p0 }
   0xa   :  { %303 = shalt.err (!%p300_p2)
}
   0xb   :  { %s304_s26 = scalar_lea.vmem %s31_s16, 1024  ;;  %p309_p4 = scmp.lt.s32.totalorder %s31_s16, %s31_s16 }
   0xc   :  { %p305_p3 = scmp.ne.s32.totalorder %s31_s16, %s304_s26  ;;  %p310_p5 = scmp.lt.s32.totalorder %s304_s26, %s304_s26 }
   0xe   :  { %p311_p6 = por %p310_p5, %p309_p4 }
  0x10   :  { %p312_p7 = pnand %p311_p6, %p305_p3 }
  0x12   :  { %315 = shalt.err (!%p312_p7)
}
  0x13   :  { %s414_s27 = smov 64   ;;  %s415_s28 = smov 4  }
  0x14   :  { %36 = dma.hbm_to_vmem [thread:$0]  %s523_s1, 1024, %s31_s16, [#allocation6], %s414_s27, %s414_s27, %s415_s28  }
  0x15   :  { %s316_s7 = scalar_lea.hbm %s522_s0, 128 }
  0x16   :  { %p317_p8 = scmp.ne.s32.totalorder %s522_s0, %s316_s7  ;;  %p320_p9 = scmp.lt.u32.totalorder %s316_s7, %s522_s0 }
  0x18   :  { %p322_p10 = pnand %p320_p9, %p317_p8 }
  0x1a   :  { %325 = shalt.err (!%p322_p10)
}
  0x1b   :  { %s326_s12 = scalar_lea.vmem %s449_s18, 128  ;;  %p331_p12 = scmp.lt.s32.totalorder %s449_s18, %s449_s18 }
  0x1c   :  { %p327_p11 = scmp.ne.s32.totalorder %s449_s18, %s326_s12  ;;  %p332_p13 = scmp.lt.s32.totalorder %s326_s12, %s326_s12 }
  0x1e   :  { %p333_p0 = por %p332_p13, %p331_p12 }
  0x20   :  { %p334_p1 = pnand %p333_p0, %p327_p11 }
  0x22   :  { %337 = shalt.err (!%p334_p1)
}
  0x23   :  { %24 = dma.hbm_to_vmem [thread:$0]  %s522_s0, 128, %s449_s18, [#allocation3], %s414_s27, %s414_s27, %s415_s28  }
  0x24   :  { %s416_s14 = smov [#allocation7]   ;;  %s338_s19 = scalar_lea.hbm %s524_s2, 256 }
  0x25   :  { %s42_s15 = sshll.u32 %s416_s14, 4  ;;  %p339_p2 = scmp.ne.s32.totalorder %s524_s2, %s338_s19  ;;  %s43_s15 = int_to_ptr.vmem [resolvable:$true] %s42_s15 }
  0x26   :  { %p342_p3 = scmp.lt.u32.totalorder %s338_s19, %s524_s2 }
  0x28   :  { %p344_p4 = pnand %p342_p3, %p339_p2 }
  0x2a   :  { %347 = shalt.err (!%p344_p4)
}
  0x2b   :  { %s348_s24 = scalar_lea.vmem %s43_s15, 256  ;;  %p353_p6 = scmp.lt.s32.totalorder %s43_s15, %s43_s15 }
  0x2c   :  { %p349_p5 = scmp.ne.s32.totalorder %s43_s15, %s348_s24  ;;  %p354_p7 = scmp.lt.s32.totalorder %s348_s24, %s348_s24 }
  0x2e   :  { %p355_p8 = por %p354_p7, %p353_p6 }
  0x30   :  { %p356_p9 = pnand %p355_p8, %p349_p5 }
  0x32   :  { %359 = shalt.err (!%p356_p9)
}
  0x33   :  { %s417_s0 = smov 128   ;;  %s418_s18 = smov 8  }
  0x34   :  { %48 = dma.hbm_to_vmem [thread:$0]  %s524_s2, 256, %s43_s15, [#allocation6], %s417_s0, %s417_s0, %s418_s18  }
  0x35   :  { %s419_s27 = smov [#allocation8]   ;;  %s360_s5 = scalar_lea.hbm %s525_s3, 16 }
  0x36   :  { %s55_s28 = sshll.u32 %s419_s27, 4  ;;  %p361_p10 = scmp.ne.s32.totalorder %s525_s3, %s360_s5  ;;  %s56_s28 = int_to_ptr.vmem [resolvable:$true] %s55_s28 }
  0x37   :  { %p364_p11 = scmp.lt.u32.totalorder %s360_s5, %s525_s3 }
  0x39   :  { %p366_p12 = pnand %p364_p11, %p361_p10 }
  0x3b   :  { %369 = shalt.err (!%p366_p12)
}
  0x3c   :  { %s370_s10 = scalar_lea.vmem %s56_s28, 16  ;;  %s374_s2 = scalar_lea.vmem %s56_s28, 32 }
  0x3d   :  { %p371_p13 = scmp.ne.s32.totalorder %s56_s28, %s370_s10  ;;  %p375_p0 = scmp.lt.s32.totalorder %s56_s28, %s56_s28 }
  0x3e   :  { %p376_p1 = scmp.lt.s32.totalorder %s374_s2, %s370_s10 }
  0x40   :  { %p377_p2 = por %p376_p1, %p375_p0 }
  0x42   :  { %p378_p3 = pnand %p377_p2, %p371_p13 }
  0x44   :  { %381 = shalt.err (!%p378_p3)
}
  0x45   :  { %58 = dma.hbm_to_vmem [thread:$0]  %s525_s3, 16, %s56_s28, [#allocation9]  }
  0x46   :  { %404 = dma.done.wait [#allocation3], 128  }
  0x47   :  { %405 = vsyncadd [#allocation3], 4294967168 }
  0x48   :  { %406 = dma.done.wait [#allocation6], 1280  }
  0x49   :  { %407 = vsyncadd [#allocation6], 4294966016 }
  0x4a   :  { %408 = dma.done.wait [#allocation9], 16  }
  0x4b   :  { %409 = vsyncadd [#allocation9], 4294967280  ;;  %v420_v0 = vmov 0.0   ;;  %vm421_vm0 = vmmov 0   ;;  %v285_v1 = vld [vmem:[#allocation5] sm:$0xff]   ;;  %v286_v2 = vld [vmem:[#allocation5 + $0x8] sm:$0xff]   ;;  %v207_v10 = vlaneseq }
  0x4c   :  { %253 = vmatprep.subr.bf16.mxu0 %v420_v0  ;;  %269 = vmatprep.mubr.msk.bf16.mxu0 %vm421_vm0, %v420_v0  ;;  %v287_v3 = vld [vmem:[#allocation5 + $0x10] sm:$0xff]   ;;  %v288_v4 = vld [vmem:[#allocation5 + $0x18] sm:$0xff]   ;;  %v289_v5 = vld [vmem:[#allocation5 + $0x20] sm:$0xff]   ;;  %v422_v14 = vmov 0   ;;  %s423_s3 = smov [#allocation10]  }
  0x4d   :  { %254 = vmatpush3.bf16.msra.mxu0 %v285_v1  ;;  %v290_v6 = vld [vmem:[#allocation5 + $0x28] sm:$0xff]   ;;  %v291_v7 = vld [vmem:[#allocation5 + $0x30] sm:$0xff]   ;;  %v292_v8 = vld [vmem:[#allocation5 + $0x38] sm:$0xff]   ;;  %v208_v12 = vshrl.u32 %v207_v10, 7  ;;  %s221_s1 = sshll.u32 %s423_s3, 4  ;;  %s222_s1 = int_to_ptr.vmem [resolvable:$true] %s221_s1 }
  0x4e   :  { %255 = vmatprep.subr.bf16.mxu0 %v420_v0  ;;  %v293_v9 = vld [vmem:[#allocation2] sm:$0xff]   ;;  %v200_v11 = vld [vmem:[#allocation8] sm:$0x1]  ;;  %v202_v18 = vld [vmem:[#allocation7] sm:$0xff]  ;;  %s382_s13 = scalar_lea.vmem %s222_s1, 256  ;;  %p387_p5 = scmp.lt.s32.totalorder %s222_s1, %s222_s1 }
  0x4f   :  { %vm201_vm1 = vcmp.gt.f32.partialorder %v200_v11, 0.5  ;;  %v209_v13 = vsub.s32 0, %v208_v12  ;;  %v203_v21 = vld [vmem:[#allocation7 + $0x8] sm:$0xff]  ;;  %p383_p4 = scmp.ne.s32.totalorder %s222_s1, %s382_s13  ;;  %p388_p6 = scmp.lt.s32.totalorder %s382_s13, %s382_s13 }
  0x50   :  { %v206_v15 = vsel %vm201_vm1, 1, %v422_v14 }
  0x51   :  { %256 = vmatpush3.bf16.msra.mxu0 %v286_v2  ;;  %v210_v16 = vrot.slane %v206_v15, %v209_v13  ;;  %p389_p7 = por %p388_p6, %p387_p5 }
  0x52   :  { %257 = vmatprep.subr.bf16.mxu0 %v420_v0 }
  0x53   :  { %vm211_vm2 = vcmp.eq.s32.totalorder %v210_v16, 1  ;;  %p390_p8 = pnand %p389_p7, %p383_p4 }
  0x55   :  { %258 = vmatpush3.bf16.msra.mxu0 %v287_v3 }
  0x56   :  { %259 = vmatprep.subr.bf16.mxu0 %v420_v0 }
  0x59   :  { %260 = vmatpush3.bf16.msra.mxu0 %v288_v4 }
  0x5a   :  { %261 = vmatprep.subr.bf16.mxu0 %v420_v0 }
  0x5d   :  { %262 = vmatpush3.bf16.msra.mxu0 %v289_v5 }
  0x5e   :  { %263 = vmatprep.subr.bf16.mxu0 %v420_v0 }
  0x61   :  { %264 = vmatpush3.bf16.msra.mxu0 %v290_v6 }
  0x62   :  { %265 = vmatprep.subr.bf16.mxu0 %v420_v0 }
  0x65   :  { %266 = vmatpush3.bf16.msra.mxu0 %v291_v7 }
  0x66   :  { %267 = vmatprep.subr.bf16.mxu0 %v420_v0 }
  0x69   :  { %268 = vmatpush3.bf16.msra.mxu0 %v292_v8 }
  0x6c   :  { %270 = vmatmul.mubr.bf16.vlgmr.msra.gmra.mrb[0].mxu0 %v293_v9 }
 0x13f   :  { %v186_v17 = vpop.f32.mrb[0].mxu0 }
 0x140   :  { %v271_v19 = vpop.f32.mrb[1].mxu0  ;;  %v212_v23 = vsel %vm211_vm2, %v202_v18, %v186_v17 }
 0x141   :  { %v189_v20 = vpop.f32.mrb[2].mxu0  ;;  %214 = vst [vmem:[#allocation10] sm:$0xff] %v212_v23 }
 0x142   :  { %v272_v22 = vpop.f32.mrb[3].mxu0  ;;  %v213_v24 = vsel %vm211_vm2, %v203_v21, %v189_v20 }
 0x143   :  { %215 = vst [vmem:[#allocation10 + $0x8] sm:$0xff] %v213_v24 }
 0x144   :  { %393 = shalt.err (!%p390_p8)
}
 0x145   :  { %s394_s16 = scalar_lea.hbm %s526_s4, 256 }
 0x146   :  { %p395_p9 = scmp.ne.s32.totalorder %s526_s4, %s394_s16  ;;  %p398_p10 = scmp.lt.u32.totalorder %s394_s16, %s526_s4 }
 0x148   :  { %p400_p11 = pnand %p398_p10, %p395_p9 }
 0x14a   :  { %403 = shalt.err (!%p400_p11)
}
 0x14b   :  { %227 = dma.vmem_to_hbm [thread:$0]  %s222_s1, 256, %s526_s4, [#allocation4], %s417_s0, %s417_s0, %s418_s18  }
 0x14c   :  { %410 = dma.done.wait [#allocation4], 256  }
 0x14d   :  { %411 = vsyncadd [#allocation4], 4294967040 }
 0x14e   :  { %231 = vsyncpa [#allocation3], 1 }
 0x14f   :  { %232 = vsyncpa [#allocation6], 1 }
 0x150   :  { %233 = vsyncpa [#allocation9], 1 }
 0x151   :  { %234 = vsyncpa [#allocation4], 1 }

</bundles_post_ra>
